<compile_context>
chip_gen: v7x
topology: tpu7x:2x2x1
jax: 0.10.0
libtpu: 0.0.40
codegen_flags: <defaults>
</compile_context>

<pallas_src>
import functools
import math

import jax
import jax.numpy as jnp
from jax.experimental import pallas as pl
from jax.experimental.pallas import tpu as pltpu


def _slim_loss_kernel(x_k_ref, w_ref, x_t_ref, loss_ref, acc_ref, row_ref, *,
                      binary_x):
    """Fused X @ W + per-row binary-cross-entropy sum.

    Grid: (i over user tiles, j over output-item tiles, k over contraction)
      x_k_ref : (tm, tk)  block of X (matmul operand dtype, e.g. bf16)
      w_ref   : (tk, tn)  block of W (matmul operand dtype)
      x_t_ref : (tm, tn)  block of X in f32, used as the BCE "input"
      loss_ref: (tm, 1)   per-user BCE row-sum output (resident across j, k)
      acc_ref : (tm, tn)  f32 matmul accumulator scratch
      row_ref : (tm, 1)   f32 per-row loss accumulator scratch (across j)
    """
    j = pl.program_id(1)
    k = pl.program_id(2)
    nj = pl.num_programs(1)
    nk = pl.num_programs(2)

    @pl.when((j == 0) & (k == 0))
    def _():
        row_ref[...] = jnp.zeros_like(row_ref)

    @pl.when(k == 0)
    def _():
        acc_ref[...] = jnp.zeros_like(acc_ref)

    acc_ref[...] += jnp.dot(
        x_k_ref[...], w_ref[...], preferred_element_type=jnp.float32
    )

    @pl.when(k == nk - 1)
    def _():
        # PyTorch F.binary_cross_entropy(input=X, target=output):
        #   loss = -(target*clamp(log(input),-100) + (1-target)*clamp(log(1-input),-100))
        pred = x_t_ref[...]        # "input" (train matrix entries)
        target = acc_ref[...]      # output = X @ W
        if binary_x:
            # For pred strictly in {0,1} the clamped-log BCE is exactly:
            #   pred==1 -> 100*(1-target), pred==0 -> 100*target  (VALU select,
            #   no EUP transcendentals).
            bce = 100.0 * jnp.where(pred > 0.5, 1.0 - target, target)
        else:
            log_p = jnp.maximum(jnp.log(pred), -100.0)
            log_1mp = jnp.maximum(jnp.log(1.0 - pred), -100.0)
            bce = -(target * log_p + (1.0 - target) * log_1mp)
        row_ref[...] += jnp.sum(bce, axis=1, keepdims=True)

        @pl.when(j == nj - 1)
        def _():
            loss_ref[...] = row_ref[...]


def _round_up(v, m):
    return (v + m - 1) // m * m


@functools.partial(
    jax.jit, static_argnames=("tm", "tn", "tk", "binary_x", "use_bf16")
)
def slim_forward_loss(x, w, *, tm=256, tn=512, tk=512, binary_x=True,
                      use_bf16=True):
    """Computes BCE(X, X @ W, reduction='none').sum(dim=1).mean()."""
    m, n = x.shape
    assert w.shape == (n, n)

    # Clamp tiles to the (aligned) problem size, then zero-pad to tile
    # multiples.  Padded rows/cols contribute exactly 0 to the loss.
    tm_e = min(tm, _round_up(m, 8))
    tn_e = min(tn, _round_up(n, 128))
    tk_e = min(tk, _round_up(n, 128))

    m_pad = _round_up(m, tm_e)
    n_pad = _round_up(n, math.lcm(tn_e, tk_e))

    x_f32 = x.astype(jnp.float32)
    w_f32 = w.astype(jnp.float32)
    if m_pad != m or n_pad != n:
        x_f32 = jnp.pad(x_f32, ((0, m_pad - m), (0, n_pad - n)))
        w_f32 = jnp.pad(w_f32, ((0, n_pad - n), (0, n_pad - n)))

    mat_dtype = jnp.bfloat16 if use_bf16 else jnp.float32
    x_mat = x_f32.astype(mat_dtype)
    w_mat = w_f32.astype(mat_dtype)

    grid = (m_pad // tm_e, n_pad // tn_e, n_pad // tk_e)

    kernel = functools.partial(_slim_loss_kernel, binary_x=binary_x)

    per_user = pl.pallas_call(
        kernel,
        out_shape=jax.ShapeDtypeStruct((m_pad, 1), jnp.float32),
        grid_spec=pltpu.PrefetchScalarGridSpec(
            num_scalar_prefetch=0,
            grid=grid,
            in_specs=[
                pl.BlockSpec((tm_e, tk_e), lambda i, j, k: (i, k)),  # X matmul
                pl.BlockSpec((tk_e, tn_e), lambda i, j, k: (k, j)),  # W
                pl.BlockSpec((tm_e, tn_e), lambda i, j, k: (i, j)),  # X for BCE
            ],
            out_specs=pl.BlockSpec((tm_e, 1), lambda i, j, k: (i, 0)),
            scratch_shapes=[
                pltpu.VMEM((tm_e, tn_e), jnp.float32),  # matmul accumulator
                pltpu.VMEM((tm_e, 1), jnp.float32),     # per-row loss accum
            ],
        ),
        compiler_params=pltpu.CompilerParams(
            dimension_semantics=("parallel", "arbitrary", "arbitrary"),
            vmem_limit_bytes=48 * 1024 * 1024,
        ),
    )(x_mat, w_mat, x_f32)

    # Final mean over the real users (padded rows contribute 0 and are sliced).
    return jnp.mean(per_user[:m, 0])


def make_synthetic_slim_weights(key, num_items, topk=8):
    """Deterministic stand-in for the ElasticNet-fitted W_sparse:
    non-negative, zero diagonal, at most `topk` nonzeros per column,
    columns scaled so each column sums to <= 1 (keeps X @ W within [0, 1])."""
    w = jax.random.uniform(key, (num_items, num_items), dtype=jnp.float32)
    w = w * (1.0 - jnp.eye(num_items, dtype=jnp.float32))  # no self-similarity
    thresh = jnp.sort(w, axis=0)[num_items - topk]  # (num_items,)
    w = jnp.where(w >= thresh[None, :], w, 0.0)
    col_sum = jnp.sum(w, axis=0, keepdims=True)
    w = w / jnp.maximum(col_sum, 1.0)
    return w


def _reference_loss(x, w, use_bf16=True):
    """Plain-JAX reference (clamped-log BCE, matching PyTorch semantics)."""
    if use_bf16:
        out = jnp.dot(x.astype(jnp.bfloat16), w.astype(jnp.bfloat16),
                      preferred_element_type=jnp.float32)
    else:
        out = x @ w
    log_p = jnp.maximum(jnp.log(x), -100.0)
    log_1mp = jnp.maximum(jnp.log(1.0 - x), -100.0)
    bce = -(out * log_p + (1.0 - out) * log_1mp)
    return jnp.mean(jnp.sum(bce, axis=1))


if __name__ == "__main__":
    key = jax.random.PRNGKey(0)
    k_x1, k_w1, k_x2, k_w2 = jax.random.split(key, 4)

    # --- Test 1: small, single-tile case --------------------------------
    num_users, num_items = 16, 256
    x1 = jax.random.bernoulli(k_x1, p=0.2, shape=(num_users, num_items)).astype(
        jnp.float32
    )
    w1 = make_synthetic_slim_weights(k_w1, num_items, topk=8)

    loss1 = slim_forward_loss(x1, w1)
    jax.block_until_ready(loss1)
    ref1 = _reference_loss(x1, w1, use_bf16=True)
    assert jnp.allclose(loss1, ref1, rtol=1e-4, atol=1e-2), (loss1, ref1)
    # Also sanity-check against the full-f32 PyTorch-equivalent reference.
    ref1_f32 = _reference_loss(x1, w1, use_bf16=False)
    assert jnp.allclose(loss1, ref1_f32, rtol=2e-2), (loss1, ref1_f32)

    # --- Test 2: multi-tile grid + padding (non-aligned shapes) ----------
    m2, n2 = 20, 300
    x2 = jax.random.bernoulli(k_x2, p=0.2, shape=(m2, n2)).astype(jnp.float32)
    w2 = make_synthetic_slim_weights(k_w2, n2, topk=8)

    loss2 = slim_forward_loss(x2, w2, tm=16, tn=128, tk=128)
    jax.block_until_ready(loss2)
    ref2 = _reference_loss(x2, w2, use_bf16=True)
    assert jnp.allclose(loss2, ref2, rtol=1e-4, atol=1e-2), (loss2, ref2)

    # --- Test 3: general (non-binary) clamped-log path -------------------
    loss3 = slim_forward_loss(x2, w2, tm=16, tn=128, tk=128, binary_x=False)
    jax.block_until_ready(loss3)
    assert jnp.allclose(loss3, ref2, rtol=1e-4, atol=1e-2), (loss3, ref2)

    print("KERNEL_OK")
</pallas_src>

<mosaic_0001>
module attributes {stable_mosaic.version = 11 : i64} {
  func.func @_slim_loss_kernel(%arg0: i32, %arg1: i32, %arg2: i32, %arg3: memref<16x256xbf16, #tpu.memory_space<vmem>>, %arg4: memref<256x256xbf16, #tpu.memory_space<vmem>>, %arg5: memref<16x256xf32, #tpu.memory_space<vmem>>, %arg6: memref<16x1xf32, #tpu.memory_space<vmem>>, %arg7: memref<16x256xf32, #tpu.memory_space<vmem>>, %arg8: memref<16x1xf32, #tpu.memory_space<vmem>>) attributes {dimension_semantics = [#tpu.dimension_semantics<parallel>, #tpu.dimension_semantics<arbitrary>, #tpu.dimension_semantics<arbitrary>], iteration_bounds = array<i64: 1, 1, 1>, scalar_prefetch = 0 : i64, scratch_operands = 2 : i64, tpu.core_type = #tpu.core_type<tc>, window_params = [{transform_indices = @transform_0, window_bounds = array<i64: 16, 256>}, {transform_indices = @transform_1, window_bounds = array<i64: 256, 256>}, {transform_indices = @transform_2, window_bounds = array<i64: 16, 256>}, {transform_indices = @transform_3, window_bounds = array<i64: 16, 1>}]} {
    %c0_i32 = arith.constant 0 : i32
    %0 = arith.cmpi eq, %arg1, %c0_i32 : i32
    %c0_i32_0 = arith.constant 0 : i32
    %1 = arith.cmpi eq, %arg2, %c0_i32_0 : i32
    %2 = arith.andi %0, %1 : i1
    %3 = arith.extui %2 : i1 to i32
    %c0_i32_1 = arith.constant 0 : i32
    %4 = arith.cmpi ne, %3, %c0_i32_1 : i32
    scf.if %4 {
      %cst_13 = arith.constant 0.000000e+00 : f32
      %17 = vector.broadcast %cst_13 : f32 to vector<16x1xf32>
      %c0_14 = arith.constant 0 : index
      %c0_15 = arith.constant 0 : index
      %18 = vector.load %arg8[%c0_14, %c0_15] : memref<16x1xf32, #tpu.memory_space<vmem>>, vector<16x1xf32>
      tpu.vector_store %arg8[%c0_14, %c0_15], %17 {strides = array<i32>} : memref<16x1xf32, #tpu.memory_space<vmem>>, vector<16x1xf32>,
    } else {
    }
    %c0_i32_2 = arith.constant 0 : i32
    %5 = arith.cmpi eq, %arg2, %c0_i32_2 : i32
    %6 = arith.extui %5 : i1 to i32
    %c0_i32_3 = arith.constant 0 : i32
    %7 = arith.cmpi ne, %6, %c0_i32_3 : i32
    scf.if %7 {
      %cst_13 = arith.constant 0.000000e+00 : f32
      %17 = vector.broadcast %cst_13 : f32 to vector<16x256xf32>
      %c0_14 = arith.constant 0 : index
      %c0_15 = arith.constant 0 : index
      %18 = vector.load %arg7[%c0_14, %c0_15] : memref<16x256xf32, #tpu.memory_space<vmem>>, vector<16x256xf32>
      tpu.vector_store %arg7[%c0_14, %c0_15], %17 {strides = array<i32>} : memref<16x256xf32, #tpu.memory_space<vmem>>, vector<16x256xf32>,
    } else {
    }
    %c0 = arith.constant 0 : index
    %c0_4 = arith.constant 0 : index
    %8 = vector.load %arg7[%c0, %c0_4] : memref<16x256xf32, #tpu.memory_space<vmem>>, vector<16x256xf32>
    %c0_5 = arith.constant 0 : index
    %c0_6 = arith.constant 0 : index
    %9 = vector.load %arg3[%c0_5, %c0_6] : memref<16x256xbf16, #tpu.memory_space<vmem>>, vector<16x256xbf16>
    %c0_7 = arith.constant 0 : index
    %c0_8 = arith.constant 0 : index
    %10 = vector.load %arg4[%c0_7, %c0_8] : memref<256x256xbf16, #tpu.memory_space<vmem>>, vector<256x256xbf16>
    %cst = arith.constant dense<0.000000e+00> : vector<16x256xf32>
    %11 = tpu.matmul %9, %10, %cst {dimension_numbers = #tpu.dot_dimension_numbers<[1], [0], [0], [1], [0, 0, 1, 1], [], []>} : vector<16x256xbf16>, vector<256x256xbf16>, vector<16x256xf32> -> vector<16x256xf32>
    %12 = arith.addf %8, %11 : vector<16x256xf32>
    %c0_9 = arith.constant 0 : index
    %c0_10 = arith.constant 0 : index
    %13 = vector.load %arg7[%c0_9, %c0_10] : memref<16x256xf32, #tpu.memory_space<vmem>>, vector<16x256xf32>
    tpu.vector_store %arg7[%c0_9, %c0_10], %12 {strides = array<i32>} : memref<16x256xf32, #tpu.memory_space<vmem>>, vector<16x256xf32>,
    %c0_i32_11 = arith.constant 0 : i32
    %14 = arith.cmpi eq, %arg2, %c0_i32_11 : i32
    %15 = arith.extui %14 : i1 to i32
    %c0_i32_12 = arith.constant 0 : i32
    %16 = arith.cmpi ne, %15, %c0_i32_12 : i32
    scf.if %16 {
      %c0_13 = arith.constant 0 : index
      %c0_14 = arith.constant 0 : index
      %17 = vector.load %arg5[%c0_13, %c0_14] : memref<16x256xf32, #tpu.memory_space<vmem>>, vector<16x256xf32>
      %c0_15 = arith.constant 0 : index
      %c0_16 = arith.constant 0 : index
      %18 = vector.load %arg7[%c0_15, %c0_16] : memref<16x256xf32, #tpu.memory_space<vmem>>, vector<16x256xf32>
      %cst_17 = arith.constant 5.000000e-01 : f32
      %19 = vector.broadcast %cst_17 : f32 to vector<16x256xf32>
      %20 = arith.cmpf ogt, %17, %19 : vector<16x256xf32>
      %cst_18 = arith.constant 1.000000e+00 : f32
      %21 = vector.broadcast %cst_18 : f32 to vector<16x256xf32>
      %22 = arith.subf %21, %18 : vector<16x256xf32>
      %23 = arith.select %20, %22, %18 : vector<16x256xi1>, vector<16x256xf32>
      %cst_19 = arith.constant 1.000000e+02 : f32
      %24 = vector.broadcast %cst_19 : f32 to vector<16x256xf32>
      %25 = arith.mulf %24, %23 : vector<16x256xf32>
      %c0_20 = arith.constant 0 : index
      %c0_21 = arith.constant 0 : index
      %26 = vector.load %arg8[%c0_20, %c0_21] : memref<16x1xf32, #tpu.memory_space<vmem>>, vector<16x1xf32>
      %cst_22 = arith.constant dense<0.000000e+00> : vector<16xf32>
      %27 = vector.multi_reduction <add>, %25, %cst_22 [1] : vector<16x256xf32> to vector<16xf32>
      %28 = vector.shape_cast %27 : vector<16xf32> to vector<16x1xf32>
      %29 = arith.addf %26, %28 : vector<16x1xf32>
      %c0_23 = arith.constant 0 : index
      %c0_24 = arith.constant 0 : index
      %30 = vector.load %arg8[%c0_23, %c0_24] : memref<16x1xf32, #tpu.memory_space<vmem>>, vector<16x1xf32>
      tpu.vector_store %arg8[%c0_23, %c0_24], %29 {strides = array<i32>} : memref<16x1xf32, #tpu.memory_space<vmem>>, vector<16x1xf32>,
      %c0_i32_25 = arith.constant 0 : i32
      %31 = arith.cmpi eq, %arg1, %c0_i32_25 : i32
      %32 = arith.extui %31 : i1 to i32
      %c0_i32_26 = arith.constant 0 : i32
      %33 = arith.cmpi ne, %32, %c0_i32_26 : i32
      scf.if %33 {
        %c0_27 = arith.constant 0 : index
        %c0_28 = arith.constant 0 : index
        %34 = vector.load %arg8[%c0_27, %c0_28] : memref<16x1xf32, #tpu.memory_space<vmem>>, vector<16x1xf32>
        %c0_29 = arith.constant 0 : index
        %c0_30 = arith.constant 0 : index
        %35 = vector.load %arg6[%c0_29, %c0_30] : memref<16x1xf32, #tpu.memory_space<vmem>>, vector<16x1xf32>
        tpu.vector_store %arg6[%c0_29, %c0_30], %34 {strides = array<i32>} : memref<16x1xf32, #tpu.memory_space<vmem>>, vector<16x1xf32>,
      } else {
      }
    } else {
    }
    return
  }
  func.func @transform_0(%arg0: i32, %arg1: i32, %arg2: i32) -> (i32, i32) {
    %c0_i32 = arith.constant 0 : i32
    return %arg0, %arg2 : i32, i32
  }
  func.func @transform_1(%arg0: i32, %arg1: i32, %arg2: i32) -> (i32, i32) {
    %c0_i32 = arith.constant 0 : i32
    return %arg2, %arg1 : i32, i32
  }
  func.func @transform_2(%arg0: i32, %arg1: i32, %arg2: i32) -> (i32, i32) {
    %c0_i32 = arith.constant 0 : i32
    return %arg0, %arg1 : i32, i32
  }
  func.func @transform_3(%arg0: i32, %arg1: i32, %arg2: i32) -> (i32, i32) {
    %c0_i32 = arith.constant 0 : i32
    %c0_i32_0 = arith.constant 0 : i32
    return %arg0, %c0_i32 : i32, i32
  }
}

</mosaic_0001>

<bundles_post_ra>
// kernel: slim_forward_loss.1
= control target key start
LH: loop header
LB: loop body
LE: loop exit
PB: predicated region body
PF: predicated region fallthrough
CT: control target
= control target key end

     0   :  { %vm20_vm0 = vcmask 7168   ;;  %v426_v34 = vmov 0.0   ;;  %s573_s1 = inlined_call_operand.vmem [shape: bf16[256,256], index: 1, kind: input, shape index: {}]   ;;  %s574_s0 = inlined_call_operand.vmem [shape: bf16[16,256], index: 0, kind: input, shape index: {}]   ;;  %s575_s2 = inlined_call_operand.vmem [shape: f32[16,256], index: 2, kind: input, shape index: {}]   ;;  %s576_s3 = inlined_call_operand.vmem [shape: f32[16,1], index: 3, kind: output, shape index: {}]  }
   0x1   :  { %v375_v0 = vld [vmem:[%s573_s1 + $0x4] ss:$8 sps:$4 sm:$0xff]   ;;  %v377_v1 = vld [vmem:[%s573_s1] ss:$8 sps:$4 sm:$0xff]   ;;  %v378_v2 = vld [vmem:[%s573_s1 + $0x14] ss:$8 sps:$4 sm:$0xff]  }
   0x2   :  { %238 = vmatprep.subr.bf16.mxu0 %v375_v0  ;;  %v380_v3 = vld [vmem:[%s573_s1 + $0x10] ss:$8 sps:$4 sm:$0xff]   ;;  %v381_v4 = vld [vmem:[%s573_s1 + $0x24] ss:$8 sps:$4 sm:$0xff]   ;;  %v383_v5 = vld [vmem:[%s573_s1 + $0x20] ss:$8 sps:$4 sm:$0xff]  }
   0x3   :  { %239 = vmatpush1.bf16.msra.mxu0 %v377_v1  ;;  %v384_v6 = vld [vmem:[%s573_s1 + $0x34] ss:$8 sps:$4 sm:$0xff]   ;;  %v386_v7 = vld [vmem:[%s573_s1 + $0x30] ss:$8 sps:$4 sm:$0xff]   ;;  %v387_v8 = vld [vmem:[%s573_s1 + $0x44] ss:$8 sps:$4 sm:$0xff]  }
   0x4   :  { %240 = vmatprep.subr.bf16.mxu0 %v378_v2  ;;  %v389_v9 = vld [vmem:[%s573_s1 + $0x40] ss:$8 sps:$4 sm:$0xff]   ;;  %v390_v10 = vld [vmem:[%s573_s1 + $0x54] ss:$8 sps:$4 sm:$0xff]   ;;  %v392_v11 = vld [vmem:[%s573_s1 + $0x50] ss:$8 sps:$4 sm:$0xff]  }
   0x5   :  { %v393_v12 = vld [vmem:[%s573_s1 + $0x64] ss:$8 sps:$4 sm:$0xff]   ;;  %v395_v14 = vld [vmem:[%s573_s1 + $0x60] ss:$8 sps:$4 sm:$0xff]   ;;  %v396_v15 = vld [vmem:[%s573_s1 + $0x74] ss:$8 sps:$4 sm:$0xff]  }
   0x6   :  { %v425_v13 = vld [vmem:[%s574_s0 + $0x4] ss:$8 sps:$4 sm:$0xff]   ;;  %v398_v16 = vld [vmem:[%s573_s1 + $0x70] ss:$8 sps:$4 sm:$0xff]   ;;  %v401_v18 = vld [vmem:[%s573_s1 + $0x80] ss:$8 sps:$4 sm:$0xff]  }
   0x7   :  { %241 = vmatpush1.bf16.msra.mxu0 %v380_v3  ;;  %270 = vmatprep.mubr.bf16.mxu0 %v425_v13  ;;  %v399_v17 = vld [vmem:[%s573_s1 + $0x84] ss:$8 sps:$4 sm:$0xff]   ;;  %v402_v19 = vld [vmem:[%s573_s1 + $0x94] ss:$8 sps:$4 sm:$0xff]   ;;  %v404_v20 = vld [vmem:[%s573_s1 + $0x90] ss:$8 sps:$4 sm:$0xff]  }
   0x8   :  { %242 = vmatprep.subr.bf16.mxu0 %v381_v4  ;;  %v405_v21 = vld [vmem:[%s573_s1 + $0xa4] ss:$8 sps:$4 sm:$0xff]   ;;  %v407_v22 = vld [vmem:[%s573_s1 + $0xa0] ss:$8 sps:$4 sm:$0xff]   ;;  %v408_v23 = vld [vmem:[%s573_s1 + $0xb4] ss:$8 sps:$4 sm:$0xff]  }
   0x9   :  { %v410_v24 = vld [vmem:[%s573_s1 + $0xb0] ss:$8 sps:$4 sm:$0xff]   ;;  %v411_v25 = vld [vmem:[%s573_s1 + $0xc4] ss:$8 sps:$4 sm:$0xff]   ;;  %v413_v26 = vld [vmem:[%s573_s1 + $0xc0] ss:$8 sps:$4 sm:$0xff]  }
   0xa   :  { %v414_v27 = vld [vmem:[%s573_s1 + $0xd4] ss:$8 sps:$4 sm:$0xff]   ;;  %v416_v28 = vld [vmem:[%s573_s1 + $0xd0] ss:$8 sps:$4 sm:$0xff]   ;;  %v417_v29 = vld [vmem:[%s573_s1 + $0xe4] ss:$8 sps:$4 sm:$0xff]  }
   0xb   :  { %243 = vmatpush1.bf16.msra.mxu0 %v383_v5  ;;  %v419_v30 = vld [vmem:[%s573_s1 + $0xe0] ss:$8 sps:$4 sm:$0xff]   ;;  %v420_v31 = vld [vmem:[%s573_s1 + $0xf4] ss:$8 sps:$4 sm:$0xff]   ;;  %v422_v32 = vld [vmem:[%s573_s1 + $0xf0] ss:$8 sps:$4 sm:$0xff]  }
   0xc   :  { %244 = vmatprep.subr.bf16.mxu0 %v384_v6  ;;  %v423_v33 = vld [vmem:[%s574_s0] ss:$8 sps:$4 sm:$0xff]   ;;  %21 = vst.msk [vmem:[#allocation3] sm:$0xff] %vm20_vm0, %v426_v34  ;;  %22 = vst.msk [vmem:[#allocation3 + $0x8] sm:$0xff] %vm20_vm0, %v426_v34  ;;  %v294_v37 = vld [vmem:[%s575_s2 + $0x10] sm:$0xff] }
   0xd   :  { %v292_v35 = vld [vmem:[%s575_s2] sm:$0xff]  ;;  %v293_v36 = vld [vmem:[%s575_s2 + $0x8] sm:$0xff]  ;;  %v295_v39 = vld [vmem:[%s575_s2 + $0x18] sm:$0xff]  ;;  %vm302_vm3 = vcmp.gt.f32.partialorder %v294_v37, 0.5 }
   0xe   :  { %vm300_vm1 = vcmp.gt.f32.partialorder %v292_v35, 0.5  ;;  %vm301_vm2 = vcmp.gt.f32.partialorder %v293_v36, 0.5  ;;  %vm303_vm4 = vcmp.gt.f32.partialorder %v295_v39, 0.5 }
   0xf   :  { %245 = vmatpush1.bf16.msra.mxu0 %v386_v7 }
  0x10   :  { %246 = vmatprep.subr.bf16.mxu0 %v387_v8 }
  0x13   :  { %247 = vmatpush1.bf16.msra.mxu0 %v389_v9  ;;  %v316_v57 = vld [vmem:[#allocation3] sm:$0xff]  ;;  %v317_v60 = vld [vmem:[#allocation3 + $0x8] sm:$0xff] }
  0x14   :  { %248 = vmatprep.subr.bf16.mxu0 %v390_v10 }
  0x17   :  { %249 = vmatpush1.bf16.msra.mxu0 %v392_v11 }
  0x18   :  { %250 = vmatprep.subr.bf16.mxu0 %v393_v12 }
  0x1b   :  { %251 = vmatpush1.bf16.msra.mxu0 %v395_v14 }
  0x1c   :  { %252 = vmatprep.subr.bf16.mxu0 %v396_v15 }
  0x1f   :  { %253 = vmatpush1.bf16.msra.mxu0 %v398_v16 }
  0x20   :  { %254 = vmatprep.subr.bf16.mxu0 %v399_v17 }
  0x23   :  { %255 = vmatpush1.bf16.msra.mxu0 %v401_v18 }
  0x24   :  { %256 = vmatprep.subr.bf16.mxu0 %v402_v19 }
  0x27   :  { %257 = vmatpush1.bf16.msra.mxu0 %v404_v20 }
  0x28   :  { %258 = vmatprep.subr.bf16.mxu0 %v405_v21 }
  0x2b   :  { %259 = vmatpush1.bf16.msra.mxu0 %v407_v22 }
  0x2c   :  { %260 = vmatprep.subr.bf16.mxu0 %v408_v23 }
  0x2f   :  { %261 = vmatpush1.bf16.msra.mxu0 %v410_v24 }
  0x30   :  { %262 = vmatprep.subr.bf16.mxu0 %v411_v25 }
  0x33   :  { %263 = vmatpush1.bf16.msra.mxu0 %v413_v26 }
  0x34   :  { %264 = vmatprep.subr.bf16.mxu0 %v414_v27 }
  0x37   :  { %265 = vmatpush1.bf16.msra.mxu0 %v416_v28 }
  0x38   :  { %266 = vmatprep.subr.bf16.mxu0 %v417_v29 }
  0x3b   :  { %267 = vmatpush1.bf16.msra.mxu0 %v419_v30 }
  0x3c   :  { %268 = vmatprep.subr.bf16.mxu0 %v420_v31 }
  0x3f   :  { %269 = vmatpush1.bf16.msra.mxu0 %v422_v32 }
  0x42   :  { %271 = vmatmul.mubr.bf16.vlgmr.msra.gmra.mrb[0].mxu0 %v423_v33 }
 0x115   :  { %v272_v38 = vpop.f32.mrb[0].mxu0 }
 0x116   :  { %v304_v40 = vsub.f32 1.0, %v272_v38  ;;  %v274_v41 = vpop.f32.mrb[1].mxu0 }
 0x117   :  { %v305_v42 = vsub.f32 1.0, %v274_v41  ;;  %v276_v43 = vpop.f32.mrb[2].mxu0 }
 0x118   :  { %v308_v44 = vsel %vm300_vm1, %v304_v40, %v272_v38  ;;  %v306_v45 = vsub.f32 1.0, %v276_v43  ;;  %v278_v46 = vpop.f32.mrb[3].mxu0 }
 0x119   :  { %v309_v47 = vsel %vm301_vm2, %v305_v42, %v274_v41  ;;  %v307_v48 = vsub.f32 1.0, %v278_v46  ;;  %v312_v49 = vmul.f32 100.0, %v308_v44 }
 0x11a   :  { %v310_v50 = vsel %vm302_vm3, %v306_v45, %v276_v43  ;;  %v313_v51 = vmul.f32 100.0, %v309_v47 }
 0x11b   :  { %v314_v52 = vmul.f32 100.0, %v310_v50  ;;  %v311_v53 = vsel %vm303_vm4, %v307_v48, %v278_v46 }
 0x11c   :  { %v315_v54 = vmul.f32 100.0, %v311_v53  ;;  %v318_v55 = vadd.f32 %v313_v51, %v312_v49 }
 0x11e   :  { %319 = vadd.xlane.f32.xlu0 %v318_v55  ;;  %v321_v56 = vadd.f32 %v315_v54, %v314_v52 }
 0x122   :  { %322 = vadd.xlane.f32.xlu0 %v321_v56 }
 0x1ab   :  { %v320_v58 = vpop.xlane.xlu0 %319 }
 0x1ac   :  { %v324_v59 = vadd.f32 %v320_v58, %v316_v57 }
 0x1ae   :  { %327 = vst.msk [vmem:[#allocation3] sm:$0xff] %vm20_vm0, %v324_v59 }
 0x1af   :  { %v323_v61 = vpop.xlane.xlu0 %322 }
 0x1b0   :  { %v325_v62 = vadd.f32 %v323_v61, %v317_v60 }
 0x1b2   :  { %328 = vst.msk [vmem:[#allocation3 + $0x8] sm:$0xff] %vm20_vm0, %v325_v62 }
 0x1b5   :  { %v332_v63 = vld [vmem:[#allocation3] sm:$0xff] }
 0x1b6   :  { %334 = vst.msk [vmem:[%s576_s3] sm:$0xff] %vm20_vm0, %v332_v63 }
 0x1b9   :  { %v333_v0 = vld [vmem:[#allocation3 + $0x8] sm:$0xff] }
 0x1ba   :  { %335 = vst.msk [vmem:[%s576_s3 + $0x8] sm:$0xff] %vm20_vm0, %v333_v0 }

</bundles_post_ra>
